<compile_context>
chip_gen: v5e
topology: v5e:2x2
jax: 0.10.0
libtpu: 0.0.40
codegen_flags: <defaults>
</compile_context>

<pallas_src>
import functools

import jax
import jax.numpy as jnp
from jax.experimental import pallas as pl
from jax.experimental.pallas import tpu as pltpu


def _round_up(n: int, m: int) -> int:
    return ((n + m - 1) // m) * m


def _bce_kernel(x_ref, w_ref, b_ref, y_ref, out_ref, acc_ref, *,
                tb: int, tpc: int, b_true: int, c_true: int):
    # x: (tb, H) native dtype, w: (H, Cp) native dtype, b: (1, Cp) f32,
    # y: (tb, C) native dtype, out: (1, 128) f32 per-core slab,
    # acc: (1, C) f32 per-lane partial sums.
    c = pl.program_id(0)          # core split axis ("parallel")
    j = pl.program_id(1)          # batch-tile axis ("arbitrary")

    @pl.when(j == 0)
    def _init():
        acc_ref[...] = jnp.zeros_like(acc_ref)

    # "model" forward: logits = x @ W + b  (MXU, f32 accumulation, native inputs).
    z = jnp.dot(x_ref[...], w_ref[...], preferred_element_type=jnp.float32)
    z = z + b_ref[...]                        # (tb, Cp) f32
    if z.shape[-1] != c_true:                 # drop lane padding of the head
        z = z[:, :c_true]                     # (tb, C) f32
    y = y_ref[...].astype(jnp.float32)        # labels upcast in-kernel

    # Numerically stable BCE-with-logits per element:
    #   max(z, 0) - z*y + log1p(exp(-|z|))
    elem = jnp.maximum(z, 0.0) - z * y + jnp.log1p(jnp.exp(-jnp.abs(z)))

    tile_start = (c * tpc + j) * tb           # global row offset (unclamped)
    is_partial = tile_start + tb > b_true

    # Interior tiles: mask-free sublane reduction into the per-lane accumulator.
    @pl.when(jnp.logical_not(is_partial))
    def _acc_full():
        acc_ref[...] += jnp.sum(elem, axis=0, keepdims=True)

    # Ragged / duplicate tiles: mask rows beyond the true batch.
    @pl.when(is_partial)
    def _acc_partial():
        row = jax.lax.broadcasted_iota(jnp.int32, elem.shape, 0)
        masked = jnp.where(row < (b_true - tile_start), elem, 0.0)
        acc_ref[...] += jnp.sum(masked, axis=0, keepdims=True)

    @pl.when(j == pl.num_programs(1) - 1)
    def _finalize():
        scale = jnp.float32(1.0 / (b_true * c_true))
        total = jnp.sum(acc_ref[...], axis=1, keepdims=True) * scale   # (1, 1)
        out_ref[...] = jnp.broadcast_to(total, out_ref.shape)          # lane-dense


def joint_loss_bce(sentence_features, weight, bias, labels, *, block_b=512):
    """Pallas equivalent of JointLossBCE.forward with a linear-head model.

    sentence_features: (B, H), weight: (H, C), bias: (C,), labels: (B, C)
    (any float/bool dtype).  Returns the scalar f32 mean BCE-with-logits loss.
    """
    B, H = sentence_features.shape
    H2, C = weight.shape
    assert H2 == H, (H2, H)
    assert labels.shape == (B, C), (labels.shape, (B, C))

    Cp = max(128, _round_up(C, 128))          # MXU/lane-aligned head width

    x_item = jnp.dtype(sentence_features.dtype).itemsize
    y_item = jnp.dtype(labels.dtype).itemsize
    w_item = jnp.dtype(weight.dtype).itemsize

    # Sublane granularity from the narrowest streamed dtype (f32->8, bf16->16, i8->32).
    sub = max(8, 32 // max(1, min(x_item, y_item)))

    def vmem_need(t):
        return (2 * t * H * x_item            # features, double-buffered
                + 2 * t * C * y_item          # labels, double-buffered
                + H * Cp * w_item             # W, single-buffered (resident)
                + Cp * 4                      # bias, single-buffered
                + 2 * 2 * 128 * 4             # output slabs
                + _round_up(C, 128) * 4)      # accumulator scratch

    # Biggest batch tile that fits the VMEM budget (leaves headroom on v7x).
    budget = 40 * 1024 * 1024
    tb = max(sub, min(_round_up(block_b, sub), _round_up(B, sub)))
    while tb > sub and vmem_need(tb) > budget:
        tb = max(sub, _round_up(tb // 2, sub))
    vmem_limit = int(min(max(vmem_need(tb) + (8 << 20), 32 << 20), 48 << 20))

    # Only the small head params get padded; the big streamed arrays do not.
    wp = jnp.pad(weight, ((0, 0), (0, Cp - C)))
    bp = jnp.pad(bias.reshape(1, C).astype(jnp.float32), ((0, 0), (0, Cp - C)))

    tiles = pl.cdiv(B, tb)
    n_split = 2 if tiles > 1 else 1           # split tiles across (up to) 2 TCs
    tpc = pl.cdiv(tiles, n_split)             # batch tiles per core
    last_tile = tiles - 1

    def batch_map(c, j):
        # Clamp duplicate trailing tiles to a valid block; their rows fall
        # beyond b_true and are masked to zero inside the kernel.
        return (jnp.minimum(c * tpc + j, last_tile), 0)

    kernel = functools.partial(_bce_kernel, tb=tb, tpc=tpc, b_true=B, c_true=C)

    cost = pl.CostEstimate(
        flops=2 * B * H * Cp + 5 * B * C,
        transcendentals=2 * B * C,            # exp + log1p per logit
        bytes_accessed=(B * H * x_item + B * C * y_item
                        + H * Cp * w_item + Cp * 4 + n_split * 128 * 4),
    )

    out = pl.pallas_call(
        kernel,
        out_shape=jax.ShapeDtypeStruct((1, n_split * 128), jnp.float32),
        grid_spec=pltpu.PrefetchScalarGridSpec(
            num_scalar_prefetch=0,
            grid=(n_split, tpc),
            in_specs=[
                pl.BlockSpec((tb, H), batch_map),                 # features (native dtype)
                pl.BlockSpec((H, Cp), lambda c, j: (0, 0),
                             pipeline_mode=pl.Buffered(1)),       # W: VMEM-resident, 1 buffer
                pl.BlockSpec((1, Cp), lambda c, j: (0, 0),
                             pipeline_mode=pl.Buffered(1)),       # bias: VMEM-resident
                pl.BlockSpec((tb, C), batch_map),                 # labels (native dtype)
            ],
            out_specs=pl.BlockSpec((1, 128), lambda c, j: (0, c)),  # per-core 128-lane slab
            scratch_shapes=[pltpu.VMEM((1, C), jnp.float32)],       # per-lane partial sums
        ),
        compiler_params=pltpu.CompilerParams(
            dimension_semantics=("parallel", "arbitrary"),
            vmem_limit_bytes=vmem_limit,
        ),
        cost_estimate=cost,
    )(sentence_features, wp, bp, labels)

    # Per-core partial losses live in lanes 0, 128, ...; add them.
    return out[0, ::128].sum()


if __name__ == "__main__":
    key = jax.random.PRNGKey(0)
    k_x, k_w, k_b, k_lbl = jax.random.split(key, 4)

    B, H, C = 24, 32, 16  # batch, hidden, number of output logits

    sentence_features = jax.random.normal(k_x, (B, H), dtype=jnp.float32)
    weight = jax.random.normal(k_w, (H, C), dtype=jnp.float32) * 0.1
    bias = jax.random.normal(k_b, (C,), dtype=jnp.float32) * 0.01
    # Labels streamed in their native (narrow) dtype; cast happens in-kernel.
    labels = jax.random.bernoulli(k_lbl, 0.5, (B, C)).astype(jnp.bfloat16)

    # Small-tile call exercises the dual-core split + ragged last tile.
    loss_tiled = joint_loss_bce(sentence_features, weight, bias, labels, block_b=16)
    # Default call exercises the single big-tile path (tile covers the batch).
    loss_default = joint_loss_bce(sentence_features, weight, bias, labels)
    jax.block_until_ready((loss_tiled, loss_default))

    # Pure-JAX reference: BCEWithLogitsLoss (mean reduction).
    logits_ref = sentence_features @ weight + bias
    y_ref = labels.astype(jnp.float32)
    elem_ref = (jnp.maximum(logits_ref, 0.0) - logits_ref * y_ref
                + jnp.log1p(jnp.exp(-jnp.abs(logits_ref))))
    loss_ref = jnp.mean(elem_ref)

    assert jnp.allclose(loss_tiled, loss_ref, atol=1e-5, rtol=1e-5), (loss_tiled, loss_ref)
    assert jnp.allclose(loss_default, loss_ref, atol=1e-5, rtol=1e-5), (loss_default, loss_ref)
    print("KERNEL_OK")
</pallas_src>

<mosaic_0001>
module attributes {stable_mosaic.version = 11 : i64} {
  func.func @_bce_kernel(%arg0: i32, %arg1: i32, %arg2: memref<16x32xf32, #tpu.memory_space<vmem>>, %arg3: memref<32x128xf32, #tpu.memory_space<vmem>>, %arg4: memref<1x128xf32, #tpu.memory_space<vmem>>, %arg5: memref<16x16xbf16, #tpu.memory_space<vmem>>, %arg6: memref<1x128xf32, #tpu.memory_space<vmem>>, %arg7: memref<1x16xf32, #tpu.memory_space<vmem>>) attributes {dimension_semantics = [#tpu.dimension_semantics<parallel>, #tpu.dimension_semantics<arbitrary>], iteration_bounds = array<i64: 2, 1>, scalar_prefetch = 0 : i64, scratch_operands = 1 : i64, tpu.core_type = #tpu.core_type<tc>, window_params = [{transform_indices = @transform_0, window_bounds = array<i64: 16, 32>}, {pipeline_mode = #tpu.pipeline_mode<synchronous>, transform_indices = @transform_1, window_bounds = array<i64: 32, 128>}, {pipeline_mode = #tpu.pipeline_mode<synchronous>, transform_indices = @transform_2, window_bounds = array<i64: 1, 128>}, {transform_indices = @transform_3, window_bounds = array<i64: 16, 16>}, {transform_indices = @transform_4, window_bounds = array<i64: 1, 128>}]} {
    %c0_i32 = arith.constant 0 : i32
    %0 = arith.cmpi eq, %arg1, %c0_i32 : i32
    %1 = arith.extui %0 : i1 to i32
    %c0_i32_0 = arith.constant 0 : i32
    %2 = arith.cmpi ne, %1, %c0_i32_0 : i32
    scf.if %2 {
      %cst_15 = arith.constant 0.000000e+00 : f32
      %35 = vector.broadcast %cst_15 : f32 to vector<1x16xf32>
      %c0_16 = arith.constant 0 : index
      %c0_17 = arith.constant 0 : index
      %36 = vector.load %arg7[%c0_16, %c0_17] : memref<1x16xf32, #tpu.memory_space<vmem>>, vector<1x16xf32>
      tpu.vector_store %arg7[%c0_16, %c0_17], %35 {strides = array<i32>} : memref<1x16xf32, #tpu.memory_space<vmem>>, vector<1x16xf32>,
    } else {
    }
    %c0 = arith.constant 0 : index
    %c0_1 = arith.constant 0 : index
    %3 = vector.load %arg2[%c0, %c0_1] : memref<16x32xf32, #tpu.memory_space<vmem>>, vector<16x32xf32>
    %c0_2 = arith.constant 0 : index
    %c0_3 = arith.constant 0 : index
    %4 = vector.load %arg3[%c0_2, %c0_3] : memref<32x128xf32, #tpu.memory_space<vmem>>, vector<32x128xf32>
    %cst = arith.constant dense<0.000000e+00> : vector<16x128xf32>
    %5 = tpu.matmul %3, %4, %cst {dimension_numbers = #tpu.dot_dimension_numbers<[1], [0], [0], [1], [0, 0, 1, 1], [], []>} : vector<16x32xf32>, vector<32x128xf32>, vector<16x128xf32> -> vector<16x128xf32>
    %c0_4 = arith.constant 0 : index
    %c0_5 = arith.constant 0 : index
    %6 = vector.load %arg4[%c0_4, %c0_5] : memref<1x128xf32, #tpu.memory_space<vmem>>, vector<1x128xf32>
    %7 = vector.broadcast %6 : vector<1x128xf32> to vector<16x128xf32>
    %8 = arith.addf %5, %7 : vector<16x128xf32>
    %9 = vector.extract_strided_slice %8 {offsets = [0, 0], sizes = [16, 16], strides = [1, 1]} : vector<16x128xf32> to vector<16x16xf32>
    %c0_6 = arith.constant 0 : index
    %c0_7 = arith.constant 0 : index
    %10 = vector.load %arg5[%c0_6, %c0_7] : memref<16x16xbf16, #tpu.memory_space<vmem>>, vector<16x16xbf16>
    %11 = arith.extf %10 : vector<16x16xbf16> to vector<16x16xf32>
    %cst_8 = arith.constant 0.000000e+00 : f32
    %12 = vector.broadcast %cst_8 : f32 to vector<16x16xf32>
    %13 = arith.maximumf %9, %12 : vector<16x16xf32>
    %14 = arith.mulf %9, %11 : vector<16x16xf32>
    %15 = arith.subf %13, %14 : vector<16x16xf32>
    %16 = math.absf %9 : vector<16x16xf32>
    %cst_9 = arith.constant 0.000000e+00 : f32
    %17 = vector.broadcast %cst_9 : f32 to vector<16x16xf32>
    %18 = arith.subf %17, %16 : vector<16x16xf32>
    %19 = math.exp %18 : vector<16x16xf32>
    %20 = math.log1p %19 : vector<16x16xf32>
    %21 = arith.addf %15, %20 : vector<16x16xf32>
    %c1_i32 = arith.constant 1 : i32
    %22 = arith.muli %arg0, %c1_i32 : i32
    %23 = arith.addi %22, %arg1 : i32
    %c16_i32 = arith.constant 16 : i32
    %24 = arith.muli %23, %c16_i32 : i32
    %c16_i32_10 = arith.constant 16 : i32
    %25 = arith.addi %24, %c16_i32_10 : i32
    %c24_i32 = arith.constant 24 : i32
    %26 = arith.cmpi sgt, %25, %c24_i32 : i32
    %true = arith.constant true
    %27 = arith.xori %26, %true : i1
    %28 = arith.extui %27 : i1 to i32
    %c0_i32_11 = arith.constant 0 : i32
    %29 = arith.cmpi ne, %28, %c0_i32_11 : i32
    scf.if %29 {
      %c0_15 = arith.constant 0 : index
      %c0_16 = arith.constant 0 : index
      %35 = vector.load %arg7[%c0_15, %c0_16] : memref<1x16xf32, #tpu.memory_space<vmem>>, vector<1x16xf32>
      %cst_17 = arith.constant dense<0.000000e+00> : vector<16xf32>
      %36 = vector.multi_reduction <add>, %21, %cst_17 [0] : vector<16x16xf32> to vector<16xf32>
      %37 = vector.shape_cast %36 : vector<16xf32> to vector<1x16xf32>
      %38 = arith.addf %35, %37 : vector<1x16xf32>
      %c0_18 = arith.constant 0 : index
      %c0_19 = arith.constant 0 : index
      %39 = vector.load %arg7[%c0_18, %c0_19] : memref<1x16xf32, #tpu.memory_space<vmem>>, vector<1x16xf32>
      tpu.vector_store %arg7[%c0_18, %c0_19], %38 {strides = array<i32>} : memref<1x16xf32, #tpu.memory_space<vmem>>, vector<1x16xf32>,
    } else {
    }
    %30 = arith.extui %26 : i1 to i32
    %c0_i32_12 = arith.constant 0 : i32
    %31 = arith.cmpi ne, %30, %c0_i32_12 : i32
    scf.if %31 {
      %35 = tpu.iota {dimensions = array<i32: 0>} : vector<16x16xi32>
      %c24_i32_15 = arith.constant 24 : i32
      %36 = arith.subi %c24_i32_15, %24 : i32
      %37 = vector.broadcast %36 : i32 to vector<16x16xi32>
      %38 = arith.cmpi slt, %35, %37 : vector<16x16xi32>
      %cst_16 = arith.constant 0.000000e+00 : f32
      %39 = vector.broadcast %cst_16 : f32 to vector<16x16xf32>
      %40 = arith.select %38, %21, %39 : vector<16x16xi1>, vector<16x16xf32>
      %c0_17 = arith.constant 0 : index
      %c0_18 = arith.constant 0 : index
      %41 = vector.load %arg7[%c0_17, %c0_18] : memref<1x16xf32, #tpu.memory_space<vmem>>, vector<1x16xf32>
      %cst_19 = arith.constant dense<0.000000e+00> : vector<16xf32>
      %42 = vector.multi_reduction <add>, %40, %cst_19 [0] : vector<16x16xf32> to vector<16xf32>
      %43 = vector.shape_cast %42 : vector<16xf32> to vector<1x16xf32>
      %44 = arith.addf %41, %43 : vector<1x16xf32>
      %c0_20 = arith.constant 0 : index
      %c0_21 = arith.constant 0 : index
      %45 = vector.load %arg7[%c0_20, %c0_21] : memref<1x16xf32, #tpu.memory_space<vmem>>, vector<1x16xf32>
      tpu.vector_store %arg7[%c0_20, %c0_21], %44 {strides = array<i32>} : memref<1x16xf32, #tpu.memory_space<vmem>>, vector<1x16xf32>,
    } else {
    }
    %c0_i32_13 = arith.constant 0 : i32
    %32 = arith.cmpi eq, %arg1, %c0_i32_13 : i32
    %33 = arith.extui %32 : i1 to i32
    %c0_i32_14 = arith.constant 0 : i32
    %34 = arith.cmpi ne, %33, %c0_i32_14 : i32
    scf.if %34 {
      %c0_15 = arith.constant 0 : index
      %c0_16 = arith.constant 0 : index
      %35 = vector.load %arg7[%c0_15, %c0_16] : memref<1x16xf32, #tpu.memory_space<vmem>>, vector<1x16xf32>
      %cst_17 = arith.constant dense<0.000000e+00> : vector<1xf32>
      %36 = vector.multi_reduction <add>, %35, %cst_17 [1] : vector<1x16xf32> to vector<1xf32>
      %37 = vector.shape_cast %36 : vector<1xf32> to vector<1x1xf32>
      %cst_18 = arith.constant 0.00260416674 : f32
      %38 = vector.broadcast %cst_18 : f32 to vector<1x1xf32>
      %39 = arith.mulf %37, %38 : vector<1x1xf32>
      %40 = vector.shape_cast %39 : vector<1x1xf32> to vector<1x1xf32>
      %41 = vector.broadcast %40 : vector<1x1xf32> to vector<1x128xf32>
      %c0_19 = arith.constant 0 : index
      %c0_20 = arith.constant 0 : index
      %42 = vector.load %arg6[%c0_19, %c0_20] : memref<1x128xf32, #tpu.memory_space<vmem>>, vector<1x128xf32>
      tpu.vector_store %arg6[%c0_19, %c0_20], %41 {strides = array<i32>} : memref<1x128xf32, #tpu.memory_space<vmem>>, vector<1x128xf32>,
    } else {
    }
    return
  }
  func.func @transform_0(%arg0: i32, %arg1: i32) -> (i32, i32) {
    %c1_i32 = arith.constant 1 : i32
    %0 = arith.muli %arg0, %c1_i32 : i32
    %1 = arith.addi %0, %arg1 : i32
    %c1_i32_0 = arith.constant 1 : i32
    %2 = arith.minsi %1, %c1_i32_0 : i32
    %c0_i32 = arith.constant 0 : i32
    %c0_i32_1 = arith.constant 0 : i32
    return %2, %c0_i32 : i32, i32
  }
  func.func @transform_1(%arg0: i32, %arg1: i32) -> (i32, i32) {
    %c0_i32 = arith.constant 0 : i32
    %c0_i32_0 = arith.constant 0 : i32
    %c0_i32_1 = arith.constant 0 : i32
    return %c0_i32, %c0_i32_0 : i32, i32
  }
  func.func @transform_2(%arg0: i32, %arg1: i32) -> (i32, i32) {
    %c0_i32 = arith.constant 0 : i32
    %c0_i32_0 = arith.constant 0 : i32
    %c0_i32_1 = arith.constant 0 : i32
    return %c0_i32, %c0_i32_0 : i32, i32
  }
  func.func @transform_3(%arg0: i32, %arg1: i32) -> (i32, i32) {
    %c1_i32 = arith.constant 1 : i32
    %0 = arith.muli %arg0, %c1_i32 : i32
    %1 = arith.addi %0, %arg1 : i32
    %c1_i32_0 = arith.constant 1 : i32
    %2 = arith.minsi %1, %c1_i32_0 : i32
    %c0_i32 = arith.constant 0 : i32
    %c0_i32_1 = arith.constant 0 : i32
    return %2, %c0_i32 : i32, i32
  }
  func.func @transform_4(%arg0: i32, %arg1: i32) -> (i32, i32) {
    %c0_i32 = arith.constant 0 : i32
    %c0_i32_0 = arith.constant 0 : i32
    return %c0_i32, %arg0 : i32, i32
  }
}

</mosaic_0001>

<bundles_post_ra>
// kernel: tpu_custom_call.1
= control target key start
LH: loop header
LB: loop body
LE: loop exit
PB: predicated region body
PF: predicated region fallthrough
CT: control target
= control target key end

     0   :  { %s1177_s0 = inlined_call_operand.hbm [shape: f32[24,32], index: 0, kind: input, shape index: {}]   ;;  %s1178_s1 = inlined_call_operand.hbm [shape: f32[32,128], index: 1, kind: input, shape index: {}]   ;;  %s1179_s2 = inlined_call_operand.vmem [shape: f32[1,128], index: 2, kind: input, shape index: {}]   ;;  %s1180_s3 = inlined_call_operand.vmem [shape: bf16[24,16], index: 3, kind: input, shape index: {}]   ;;  %s1181_s4 = inlined_call_operand.hbm [shape: f32[1,256], index: 4, kind: output, shape index: {}]  }
   0x1   :  { %1186 = sst [smem:[#allocation16_spill]] %s1178_s1 }
   0x2   :  { %9 = vsyncpa [#allocation4], 0 }
   0x3   :  { %11 = vsyncpa [#allocation4 + $0x1], 0 }
   0x4   :  { %12 = vsyncpa [#allocation7], 0 }
   0x5   :  { %13 = vsyncpa [#allocation5], 0 }
   0x6   :  { %15 = vsyncpa [#allocation5 + $0x1], 0  ;;  %s935_s15 = smov 0   ;;  %s937_s16 = smov 0  }
   0x7   :  { %s939_s17 = smov 0   ;;  %s941_s18 = smov 0  }
   0x8   :  { %s943_s19 = smov 0   ;;  %s945_s20 = smov 0  }
   0x9   :  { %s947_s21 = smov 0   ;;  %s949_s22 = smov 0  }
   0xa   :  { %s951_s23 = smov 0  }
   0xb LB: > { %1187 = sst [smem:[#allocation12_spill]] %s889_s20  ;;  %s584_s24 = sadd.s32 4294967295, %s901_s23   ;;  %s901_s23 = sphi %s951_s23, %s21_s23   ;;  %s897_s22 = sphi %s949_s22, %s1203_s22   ;;  %s893_s21 = sphi %s947_s21, %s1202_s21   ;;  %s889_s20 = sphi %s945_s20, %s1201_s20   ;;  %s885_s19 = sphi %s943_s19, %s1208_s19   ;;  %s881_s18 = sphi %s941_s18, %s1207_s18   ;;  %s877_s17 = sphi %s939_s17, %s1206_s17   ;;  %s873_s16 = sphi %s937_s16, %s1205_s16   ;;  %s869_s15 = sphi %s935_s15, %s1204_s15  }
   0xc   : > { %1188 = sst [smem:[#allocation13_spill]] %s897_s22  ;;  %s585_s25 = sadd.s32 4294967294, %s901_s23  }
   0xd   : > { %s33_s26 = sadd.s32 1, %s897_s22  ;;  %p38_p0 = scmp.lt.s32.totalorder %s897_s22, 1 }
   0xe   : > { %p35_p1 = scmp.ge.s32.totalorder %s33_s26, 2  ;;  %s46_s27 = sadd.s32 1, %s889_s20 }
   0xf   : > { %s984_s28 = scalar_select %p38_p0, %s897_s22, 1 }
  0x10   : > { %s1210_s26 = smov (%p35_p1, %s33_s26), 0  ;;  %p53_p2 = scmp.ne.s32.totalorder %s889_s20, %s885_s19 }
  0x11   : > { %1189 = sst [smem:[#allocation14_spill]] %s1210_s26  ;;  %p54_p3 = scmp.eq.s32.totalorder %s901_s23, 0 }
  0x12   : > { %p41_p4 = scmp.lt.s32.totalorder %s1210_s26, 1  ;;  %p59_p5 = scmp.ne.s32.totalorder %s885_s19, %s881_s18 }
  0x13   : > { %p993_p6 = por %p54_p3, %p53_p2  ;;  %p997_p7 = scmp.eq.s32.totalorder %s584_s24, 0 }
  0x14   : > { %s42_s5 = scalar_select %p41_p4, %s1210_s26, 1 }
  0x15   : > { %p1004_p8 = por %p997_p7, %p59_p5  ;;  %s143_s7 = ssub.s32 %s897_s22, %s1210_s26 }
  0x16   : > { %s43_s8 = ssub.s32 %s984_s28, %s42_s5  ;;  %p144_p9 = scmp.eq.s32.totalorder %s143_s7, 0 }
  0x17   : > { %p44_p10 = scmp.eq.s32.totalorder %s43_s8, 0  ;;  %s146_s9 = sadd.s32 1, %s877_s17 }
  0x18   : > { %s1013_s10 = scalar_select %p144_p9, %s877_s17, %s146_s9  }
  0x19   : > { %s1016_s11 = scalar_select %p44_p10, %s889_s20, %s46_s27  }
  0x1a   : > { %p156_p11 = scmp.ne.s32.totalorder %s877_s17, %s873_s16  ;;  %p157_p12 = scmp.eq.s32.totalorder %s584_s24, 1 }
  0x1b   : > { %1193 = sst [smem:[#allocation15_spill]] %s1016_s11  ;;  %p162_p13 = scmp.ne.s32.totalorder %s873_s16, %s869_s15 }
  0x1c   : > { %p163_p0 = scmp.eq.s32.totalorder %s585_s25, 1  ;;  %p1022_p1 = por %p157_p12, %p156_p11 }
  0x1d   : > { %p586_p2 = scmp.ge.s32.totalorder %s901_s23, 1  ;;  %p170_p4 = scmp.lt.s32.totalorder %s901_s23, 3 }
  0x1e   : > { %p1027_p3 = por %p163_p0, %p162_p13  ;;  %s1196_s1 = sld [smem:[#allocation16_spill]] }
  0x1f   : > { %p1035_p5 = pnand %p586_p2, %p170_p4  ;;  %s903_s24 = smov [#allocation6]  }
  0x20   : > { %s183_s25 = sshll.u32 %s903_s24, 4  ;;  %s904_s7 = smov 128   ;;  %s184_s25 = int_to_ptr.vmem [resolvable:$true] %s183_s25 }
  0x21   : > { %p624_p9 = pneg %p1035_p5  ;;  %s905_s8 = smov 8  }
  0x22   : > { %p1185_p11 = scmp.ge.s32.totalorder %s901_s23, 2 }
  0x23   : > { %p625_p10 = pnand %p624_p9, %p997_p7 }
  0x24   : > { %s181_s27 = sshll.u32 %s1196_s1, 4  ;;  %196 = sbr.rel (%p1185_p11) target bundleno = 77 (0x4d), region = 24  ;;  %s182_s27 = int_to_ptr.hbm [resolvable:$true] %s181_s27 }
  0x25   : > { %627 = dma.hbm_to_vmem [thread:$0]  (!%p625_p10), %s182_s27, 512, %s184_s25, [#allocation7], %s904_s7, %s904_s7, %s905_s8  }
  0x29   : > { %199 = sbr.rel (!%p993_p6) target bundleno = 77 (0x4d), region = 28  ;;  %s200_s9 = sand.u32 (%p993_p6), 1, %s889_s20  }
  0x2a   : > { %s590_s14 = sshll.u32 (%p993_p6), %s984_s28, 1  ;;  %s589_s18 = sshll.u32 (%p993_p6), %s200_s9, 4 }
  0x2b   : > { %s209_s24 = ssub.s32 (%p993_p6), 3, %s590_s14  ;;  %s1053_s7 = scalar_lea.sflag (%p993_p6), [#allocation4], %s200_s9 }
  0x2c   : > { %p210_p12 = scmp.lt.s32.totalorder (%p993_p6), %s209_s24, 2  ;;  %s204_s8 = scalar_lea.vmem (%p993_p6), [#allocation3], %s589_s18 }
  0x2e   : > { %s1212_s24 = smov (!%p210_p12, %s209_s24), 2 }
  0x2f   : > { %s591_s1 = sshll.u32 %s1212_s24, 3 }
  0x30   : > { %s213_s27 = ssub.s32 16, %s591_s1 }
  0x31   : > { %s214_s25 = sshll.u32 %s213_s27, 4 }
  0x32   : > { %215 = vsyncadd %s1053_s7, %s214_s25  ;;  %p1056_p6 = scmp.ne.s32.totalorder %s591_s1, 0  ;;  %s608_s14 = sshll.u32 %s984_s28, 4 }
  0x33   : > { %s218_s11 = scalar_lea.hbm %s1177_s0, %s608_s14  ;;  %s1064_s20 = sshll.u32 %s204_s8, 4  ;;  %s223_s20 = int_to_ptr.vmem [resolvable:$true] %s1064_s20 }
  0x34   : > { %s220_s9 = sshll.u32 %s218_s11, 4  ;;  %s595_s18 = sshll.u32 %s1212_s24, 7  ;;  %s1067_s9 = int_to_ptr.hbm [resolvable:$true] %s220_s9 }
  0x35   : > { %s752_s27 = sshra.s32 %s1067_s9, 4  ;;  %s754_s1 = sshrl.u32 %s595_s18, 4  ;;  %s753_s27 = int_to_ptr.hbm [resolvable:$true] %s752_s27 }
  0x36   : > { %s759_s25 = scalar_lea.hbm %s753_s27, %s754_s1  ;;  %s763_s28 = scalar_lea.hbm %s1177_s0, 24 }
  0x37   : > { %p760_p13 = scmp.ne.s32.totalorder %s753_s27, %s759_s25  ;;  %p765_p4 = scmp.lt.s32.totalorder %s763_s28, %s759_s25 }
  0x39   : > { %p761_p0 = pnand %p760_p13, %p1056_p6 }
  0x3b   : > { %p762_p2 = pneg %p761_p0 }
  0x3d   : > { %p767_p9 = pnand %p765_p4, %p762_p2 }
  0x3f   : > { %770 = shalt.err (!%p767_p9)
}
  0x40   : > { %s771_s11 = sshra.s32 %s223_s20, 4  ;;  %s906_s14 = smov [#allocation3]   ;;  %s772_s11 = int_to_ptr.vmem [resolvable:$true] %s771_s11 }
  0x41   : > { %s778_s8 = scalar_lea.vmem %s772_s11, %s754_s1  ;;  %s782_s27 = scalar_lea.vmem %s906_s14, 32 }
  0x42   : > { %p779_p10 = scmp.ne.s32.totalorder %s772_s11, %s778_s8  ;;  %p784_p13 = scmp.lt.s32.totalorder %s782_s27, %s778_s8 }
  0x44   : > { %p780_p12 = pnand %p779_p10, %p1056_p6 }
  0x46   : > { %p781_p11 = pneg %p780_p12 }
  0x48   : > { %p786_p0 = pnand %p784_p13, %p781_p11 }
  0x4a   : > { %789 = shalt.err (!%p786_p0)
}
  0x4b   : > { %s907_s22 = smov 128   ;;  %s908_s25 = smov 8  }
  0x4c   : > { %228 = dma.hbm_to_vmem [thread:$0]  (%p1056_p6), %s1067_s9, %s595_s18, %s223_s20, %s1053_s7, %s907_s22, %s907_s22, %s908_s25  }
  0x4d PF: > { %257 = sbr.rel (%p1035_p5) target bundleno = 429 (0x1ad), region = 36  ;;  %s259_s1 = sand.u32 (!%p1035_p5), 1, %s885_s19  }
  0x4e   : > { %s597_s26 = sshll.u32 (!%p1035_p5), %s259_s1, 4  ;;  %s260_s28 = scalar_lea.sflag (!%p1035_p5), [#allocation4], %s259_s1 }
  0x4f   : > { %s263_s11 = scalar_lea.vmem (!%p1035_p5), [#allocation3], %s597_s26 }
  0x52   : > { %856 = dma.done.wait (%p1004_p8), %s260_s28, 256  }
  0x53   : > { %858 = vsyncadd (%p1004_p8), %s260_s28, 4294967040 }
  0x54   : > { %860 = dma.done.wait (%p997_p7), [#allocation7], 512  }
  0x55   : > { %862 = vsyncadd (%p997_p7), [#allocation7], 4294966784  ;;  %vm337_vm0 = vcmask 122880   ;;  %s303_s20 = sand.u32 1, %s873_s16   ;;  %v909_v0 = vmov 0.0   ;;  %v344_v1 = vld [vmem:[#allocation6 + $0x18] sm:$0xff] }
  0x56   : > { %338 = vst.msk [vmem:[#allocation2] sm:$0x1] %vm337_vm0, %v909_v0  ;;  %v343_v2 = vld [vmem:[#allocation6 + $0x10] sm:$0xff]  ;;  %368 = vmatpush.msra.mxu0 %v344_v1  ;;  %613 = vmatpush.msra.mxu1 %v344_v1  ;;  %v342_v3 = vld [vmem:[#allocation6 + $0x8] sm:$0xff]  ;;  %v341_v4 = vld [vmem:[#allocation6] sm:$0xff]  ;;  %vm349_vm1 = vcmask 261120  }
  0x57   : > { %v339_v5 = vld [vmem:[%s263_s11] sm:$0xff]  ;;  %v340_v6 = vld [vmem:[%s263_s11 + $0x8] sm:$0xff]  ;;  %s603_s30 = sshll.u32 %s893_s21, 4  ;;  %p314_p7 = scmp.lt.s32.totalorder %s893_s21, 1 }
  0x58   : > { %369 = vmatpush.msra.mxu0 %v343_v2  ;;  %614 = vmatpush.msra.mxu1 %v343_v2  ;;  %s1106_s6 = sadd.s32 16, %s603_s30  ;;  %v713_v7 = vld [vmem:[%s1179_s2] ss:$0 sm:$0xff]  ;;  %s1118_s27 = scalar_lea.vmem [#allocation8], %s303_s20 }
  0x59   : > { %s315_s5 = scalar_select %p314_p7, %s893_s21, 1 }
  0x5a   : > { %370 = vmatpush.msra.mxu0 %v342_v3  ;;  %615 = vmatpush.msra.mxu1 %v342_v3  ;;  %p604_p5 = scmp.gt.s32.totalorder %s1106_s6, 24 }
  0x5b   : > { %s599_s29 = sshll.u32 %s315_s5, 1 }
  0x5c   : > { %371 = vmatpush.msra.mxu0 %v341_v4  ;;  %616 = vmatpush.msra.mxu1 %v341_v4  ;;  %p321_p8 = scmp.lt.s32.totalorder %s599_s29, 2 }
  0x5d   : > { %601 = vmatmul.msk.f32.vlgmr.msra.gmra.mxu0 %vm349_vm1, %v339_v5  ;;  %602 = vmatmul.msk.f32.vlgmr.msra.gmra.mxu1 %vm349_vm1, %v340_v6 }
  0x5e   : > { %s1214_s29 = smov (!%p321_p8, %s599_s29), 2 }
  0x5f   : > { %s600_s9 = sshll.u32 %s1214_s29, 2 }
  0x60   : > { %s324_s14 = scalar_lea.vmem %s1180_s3, %s600_s9 }
  0x61   : > { %v610_v19 = vld [vmem:[%s324_s14] sm:$0xff]  }
  0x62   : > { %v611_v24 = vunpack.c.l.bf16 %v610_v19  ;;  %v612_v26 = vunpack.c.h.bf16 %v610_v19 }
  0xda   : > { %v373_v8 = vpop.f32.mrf.mxu0  ;;  %v376_v9 = vpop.f32.mrf.mxu1 }
  0xdb   : > { %v374_v10 = vadd.f32 %v713_v7, %v373_v8  ;;  %v377_v11 = vadd.f32 %v713_v7, %v376_v9 }
  0xdd   : > { %v389_v12 = vand.u32 2147483647, %v374_v10  ;;  %v390_v13 = vand.u32 2147483647, %v377_v11  ;;  %v383_v28 = vmax.f32 %v374_v10, 0.0  ;;  %v385_v29 = vmul.f32 %v611_v24, %v374_v10 }
  0xde   : > { %v384_v32 = vmax.f32 %v377_v11, 0.0  ;;  %v386_v33 = vmul.f32 %v612_v26, %v377_v11 }
  0xdf   : > { %v391_v14 = vsub.f32 0.0, %v389_v12  ;;  %v392_v15 = vsub.f32 0.0, %v390_v13  ;;  %v387_v39 = vsub.f32 %v383_v28, %v385_v29 }
  0xe0   : > { %v388_v43 = vsub.f32 %v384_v32, %v386_v33 }
  0xe1   : > { %v393_v16 = vmul.f32 1.442695, %v391_v14  ;;  %v395_v17 = vmul.f32 1.442695, %v392_v15 }
  0xe3   : > { %714 = vpow2.f32 %v393_v16 }
  0xe4   : > { %716 = vpow2.f32 %v395_v17 }
  0xe9   : > { %v715_v18 = vpop.eup %714 }
  0xea   : > { %v717_v20 = vpop.eup %716  ;;  %v397_v21 = vadd.f32 1.0, %v715_v18  ;;  %v400_v22 = vmul.f32 -0.5, %v715_v18  ;;  %v403_v30 = vand.u32 2147483647, %v715_v18 }
  0xeb   : > { %v406_v23 = vadd.f32 1.0, %v717_v20  ;;  %v409_v25 = vmul.f32 -0.5, %v717_v20  ;;  %v412_v34 = vand.u32 2147483647, %v717_v20 }
  0xec   : > { %718 = vlog2.f32 %v397_v21  ;;  %v401_v27 = vadd.f32 1.0, %v400_v22  ;;  %vm404_vm2 = vcmp.lt.f32.partialorder %v403_v30, 0.0004427343 }
  0xed   : > { %720 = vlog2.f32 %v406_v23  ;;  %v410_v31 = vadd.f32 1.0, %v409_v25  ;;  %vm413_vm3 = vcmp.lt.f32.partialorder %v412_v34, 0.0004427343 }
  0xee   : > { %v402_v38 = vmul.f32 %v715_v18, %v401_v27 }
  0xef   : > { %v411_v41 = vmul.f32 %v717_v20, %v410_v31 }
  0xf2   : > { %v719_v35 = vpop.eup %718 }
  0xf3   : > { %v721_v36 = vpop.eup %720  ;;  %v399_v37 = vmul.f32 0.6931472, %v719_v35  ;;  %424 = sbr.rel (%p604_p5) target bundleno = 267 (0x10b), region = 52 }
  0xf4   : > { %v408_v40 = vmul.f32 0.6931472, %v721_v36 }
  0xf5   : > { %v405_v42 = vsel %vm404_vm2, %v402_v38, %v399_v37 }
  0xf6   : > { %v415_v44 = vadd.f32 %v405_v42, %v387_v39  ;;  %v414_v45 = vsel %vm413_vm3, %v411_v41, %v408_v40 }
  0xf7   : > { %v416_v46 = vadd.f32 %v414_v45, %v388_v43 }
  0xf8   : > { %vm426_vm4 = vcmask 130048   ;;  %v425_v55 = vld [vmem:[#allocation2] sm:$0x1] }
  0xf9   : > { %v427_v47 = vsel %vm426_vm4, %v415_v44, 0.0  ;;  %v428_v48 = vsel %vm426_vm4, %v416_v46, 0.0 }
  0xfa   : > { %v429_v49 = vadd.f32 %v428_v48, %v427_v47 }
  0xfc   : > { %v430_v50 = vrot.slane %v429_v49, 4 }
  0xfe   : > { %v431_v51 = vadd.f32 %v430_v50, %v429_v49 }
 0x100   : > { %v432_v52 = vrot.slane %v431_v51, 2 }
 0x102   : > { %v433_v53 = vadd.f32 %v432_v52, %v431_v51 }
 0x104   : > { %v434_v54 = vrot.slane %v433_v53, 1 }
 0x106   : > { %v435_v56 = vadd.f32 %v434_v54, %v433_v53 }
 0x108   : > { %v436_v57 = vadd.f32 %v435_v56, %v425_v55 }
 0x10a   : > { %438 = vst.msk [vmem:[#allocation2] sm:$0x1] %vm337_vm0, %v436_v57 }
 0x10b PF: > { %p605_p11 = scmp.le.s32.totalorder %s1106_s6, 24 }
 0x10c   : > { %s445_s22 = ssub.s32 (!%p605_p11), 24, %s603_s30 }
 0x10d   : > { %441 = sbr.rel (%p605_p11) target bundleno = 300 (0x12c), region = 56 }
 0x112   : > { %v442_v58 = vlaneseq  ;;  %v446_v59 = vstv %s445_s22  ;;  %vm452_vm5 = vcmask 130048   ;;  %v451_v8 = vld [vmem:[#allocation2] sm:$0x1] }
 0x114   : > { %v443_v60 = vshrl.u32 %v442_v58, 7 }
 0x116   : > { %v444_v61 = vadd.s32 8, %v443_v60  ;;  %vm447_vm6 = vcmp.lt.s32.totalorder %v443_v60, %v446_v59 }
 0x117   : > { %v449_v62 = vsel %vm447_vm6, %v415_v44, 0.0 }
 0x118   : > { %vm448_vm7 = vcmp.lt.s32.totalorder %v444_v61, %v446_v59  ;;  %v453_v63 = vsel %vm452_vm5, %v449_v62, 0.0 }
 0x119   : > { %v450_v0 = vsel %vm448_vm7, %v416_v46, 0.0 }
 0x11a   : > { %v454_v1 = vsel %vm452_vm5, %v450_v0, 0.0 }
 0x11b   : > { %v455_v2 = vadd.f32 %v454_v1, %v453_v63 }
 0x11d   : > { %v456_v3 = vrot.slane %v455_v2, 4 }
 0x11f   : > { %v457_v4 = vadd.f32 %v456_v3, %v455_v2 }
 0x121   : > { %v458_v5 = vrot.slane %v457_v4, 2 }
 0x123   : > { %v459_v6 = vadd.f32 %v458_v5, %v457_v4 }
 0x125   : > { %v460_v7 = vrot.slane %v459_v6, 1 }
 0x127   : > { %v461_v9 = vadd.f32 %v460_v7, %v459_v6 }
 0x129   : > { %v462_v10 = vadd.f32 %v461_v9, %v451_v8 }
 0x12b   : > { %464 = vst.msk [vmem:[#allocation2] sm:$0x1] %vm337_vm0, %v462_v10 }
 0x12c PF: > { %s484_s26 = scalar_lea.hbm %s1181_s4, %s893_s21  ;;  %s486_s28 = sshll.u32 %s1118_s27, 4  ;;  %s487_s28 = int_to_ptr.vmem [resolvable:$true] %s486_s28 }
 0x12d   : > { %s488_s11 = sshll.u32 %s484_s26, 4  ;;  %s476_s30 = scalar_lea.sflag [#allocation5], %s303_s20  ;;  %s489_s11 = int_to_ptr.hbm [resolvable:$true] %s488_s11 }
 0x12e   : > { %s805_s6 = sshra.s32 %s489_s11, 4  ;;  %s811_s21 = scalar_lea.hbm %s1181_s4, 2  ;;  %s806_s6 = int_to_ptr.hbm [resolvable:$true] %s805_s6 }
 0x12f   : > { %s807_s5 = scalar_lea.hbm %s806_s6, 1  ;;  %p812_p9 = scmp.lt.s32.totalorder %s806_s6, %s1181_s4 }
 0x130   : > { %p808_p6 = scmp.ne.s32.totalorder %s806_s6, %s807_s5  ;;  %p813_p10 = scmp.lt.s32.totalorder %s811_s21, %s807_s5 }
 0x132   : > { %v468_v11 = vld [vmem:[#allocation2] sm:$0x1]  ;;  %p809_p2 = pnand %p808_p6, %p1022_p1  ;;  %p814_p12 = por %p813_p10, %p812_p9 }
 0x133   : > { %v470_v12 = vsel %vm337_vm0, %v468_v11, 0.0 }
 0x134   : > { %471 = vadd.xlane.f32.xlu0 %v470_v12  ;;  %p810_p4 = pneg %p809_p2 }
 0x136   : > { %p815_p13 = pnand %p814_p12, %p810_p4 }
 0x1a7   : > { %v472_v13 = vpop.xlane.xlu0 %471 }
 0x1a8   : > { %v473_v14 = vmul.f32 0.0026041667, %v472_v13 }
 0x1aa   : > { %474 = vst [vmem:[%s1118_s27] sm:$0x1] %v473_v14 }
 0x1ab   : > { %818 = shalt.err (!%p815_p13)
}
 0x1ac   : > { %622 = dma.vmem_to_hbm [thread:$0]  (%p1022_p1), %s487_s28, 16, %s489_s11, %s476_s30  }
 0x1ad PF: > { %s500_s20 = sand.u32 1, %s869_s15   ;;  %p1199_p0 = scmp.ge.s32.totalorder %s901_s23, 2 }
 0x1ae   : > { %s501_s18 = scalar_lea.sflag [#allocation5], %s500_s20 }
 0x1af   : > { %p629_p7 = pnand %p1199_p0, %p1027_p3 }
 0x1b1   : > { %p630_p8 = pneg %p629_p7 }
 0x1b3   : > { %864 = dma.done.wait (%p630_p8), %s501_s18, 16  }
 0x1b4   : > { %866 = vsyncadd (%p630_p8), %s501_s18, 4294967280  ;;  %s21_s23 = sadd.s32 1, %s901_s23   ;;  %s1200_s12 = sld [smem:[#allocation12_spill]] }
 0x1b5   : > { %p18_p5 = scmp.ge.s32.totalorder %s21_s23, 4   ;;  %s1201_s20 = sld [smem:[#allocation15_spill]] }
 0x1b6   : > { %s1202_s21 = sld [smem:[#allocation13_spill]]  ;;  %s1204_s15 = smov %s873_s16 }
 0x1b7   : > { %s1203_s22 = sld [smem:[#allocation14_spill]]  ;;  %s1205_s16 = smov %s877_s17 }
 0x1b8   : > { %s1206_s17 = smov %s1013_s10  ;;  %s1207_s18 = smov %s885_s19 }
 0x1b9   :  { %20 = sbr.rel (!%p18_p5) target bundleno = 11 (0xb), region = 104 }
 0x1ba   : > { %s1208_s19 = smov %s1200_s12 }
 0x1be   :  { %506 = vsyncpa [#allocation4], 1 }
 0x1bf   :  { %508 = vsyncpa [#allocation4 + $0x1], 1 }
 0x1c0   :  { %509 = vsyncpa [#allocation7], 1 }
 0x1c1   :  { %510 = vsyncpa [#allocation5], 1 }
 0x1c2   :  { %512 = vsyncpa [#allocation5 + $0x1], 1 }

</bundles_post_ra>
